<compile_context>
chip_gen: v6e
topology: v6e:2x2x1
jax: 0.10.0
libtpu: 0.0.40
codegen_flags: <defaults>
</compile_context>

<pallas_src>
import functools

import jax
import jax.numpy as jnp
from jax.experimental import pallas as pl
from jax.experimental.pallas import tpu as pltpu


def _cdiv(a: int, b: int) -> int:
    return (a + b - 1) // b


def _ceil_to(x: int, m: int) -> int:
    return ((x + m - 1) // m) * m


def _balanced_tile(dim: int, max_tile: int, align: int) -> int:
    """Largest ~max_tile tile that splits `dim` into equal aligned tiles.

    Keeps padding to < (num_tiles * align) instead of up to a full tile.
    """
    n = _cdiv(dim, max_tile)
    return _ceil_to(_cdiv(dim, n), align)


def _megacore_split(np_pad: int, tn_e: int) -> int:
    """If there would be a single (i, j) output tile, split the (already
    padded, 128-aligned) N extent into >= 2 tiles WITHOUT adding padding, so
    both TensorCores on megacore parts (v7x) get work."""
    q = np_pad // 128
    if q < 2:
        return tn_e
    f = next(d for d in range(2, q + 1) if q % d == 0)  # smallest factor >= 2
    return (q // f) * 128


# --------------------------------------------------------------------------
# Kernels
# --------------------------------------------------------------------------
def _gated_relu_kernel_single_k(x_ref, u_ref, w_ref, o_ref):
    """Whole reduction (K) in one step: no scratch, one output store per tile."""
    x = x_ref[...]
    gate = jnp.dot(x, u_ref[...], preferred_element_type=jnp.float32)
    lin = jnp.dot(x, w_ref[...], preferred_element_type=jnp.float32)
    # torch.sign(F.relu(z)) == 1.0 iff z > 0.
    # TODO(synk): NaN gate logits map to 0 here; torch would propagate NaN.
    o_ref[...] = jnp.where(gate > 0.0, lin, 0.0).astype(o_ref.dtype)


def _gated_relu_kernel_multi_k(x_ref, u_ref, w_ref, o_ref, gate_acc, lin_acc):
    """K innermost ('arbitrary') grid axis; both products accumulate in f32
    VMEM scratch; output is written exactly once on the last K step."""
    k = pl.program_id(2)
    x = x_ref[...]
    gate = jnp.dot(x, u_ref[...], preferred_element_type=jnp.float32)
    lin = jnp.dot(x, w_ref[...], preferred_element_type=jnp.float32)

    @pl.when(k == 0)
    def _():  # initialize with the first partial product (no zero-then-+=)
        gate_acc[...] = gate
        lin_acc[...] = lin

    @pl.when(k > 0)
    def _():
        gate_acc[...] += gate
        lin_acc[...] += lin

    @pl.when(k == pl.num_programs(2) - 1)
    def _():
        o_ref[...] = jnp.where(gate_acc[...] > 0.0, lin_acc[...], 0.0).astype(
            o_ref.dtype
        )


# --------------------------------------------------------------------------
# Forward
# --------------------------------------------------------------------------
@functools.partial(jax.jit, static_argnames=("n_out", "tm", "tn", "tk"))
def _gated_relu_forward(x, U_b, Wt_b, *, n_out, tm, tn, tk):
    """x: (M, K). U_b/Wt_b: (Kp, Np) bf16, pre-padded/transposed. Returns
    (M, n_out) in x.dtype."""
    M, K = x.shape
    Kp, Np = U_b.shape
    out_dtype = x.dtype

    # Batch tile (depends on M only; weights were planned at prep time).
    tm_e = _balanced_tile(M, tm, 16)
    Mp = _cdiv(M, tm_e) * tm_e
    gi = Mp // tm_e

    tn_e = tn
    gj = Np // tn_e
    if gi == 1 and gj == 1:  # keep both TensorCores busy on megacore parts
        tn_e = _megacore_split(Np, tn_e)
        gj = Np // tn_e

    tk_e = tk
    gk = Kp // tk_e

    # Only x is padded per call (zero K-padding contributes 0 to both dots).
    xb = x.astype(jnp.bfloat16)
    if (Mp, Kp) != (M, K):
        xb = jnp.pad(xb, ((0, Mp - M), (0, Kp - K)))

    cost = pl.CostEstimate(
        flops=4 * Mp * Np * Kp,  # two GEMMs
        transcendentals=0,
        bytes_accessed=(
            Mp * Kp * 2 * gj                      # x re-read once per j block
            + 2 * Kp * Np * 2 * gi                # U, W.T re-read once per i block
            + Mp * Np * jnp.dtype(out_dtype).itemsize
        ),
    )

    if gk == 1:
        # Single K step: whole reduction per tile, no accumulator scratch.
        grid_spec = pltpu.PrefetchScalarGridSpec(
            num_scalar_prefetch=0,
            grid=(gi, gj),
            in_specs=[
                pl.BlockSpec((tm_e, Kp), lambda i, j: (i, 0)),    # x
                pl.BlockSpec((Kp, tn_e), lambda i, j: (0, j)),    # U
                pl.BlockSpec((Kp, tn_e), lambda i, j: (0, j)),    # W.T
            ],
            out_specs=pl.BlockSpec((tm_e, tn_e), lambda i, j: (i, j)),
        )
        kernel = _gated_relu_kernel_single_k
        dims = ("parallel", "parallel")
    else:
        # Output block index_map ignores k and k is the innermost 'arbitrary'
        # axis, so the output tile is resident across the reduction.
        grid_spec = pltpu.PrefetchScalarGridSpec(
            num_scalar_prefetch=0,
            grid=(gi, gj, gk),
            in_specs=[
                pl.BlockSpec((tm_e, tk_e), lambda i, j, k: (i, k)),   # x
                pl.BlockSpec((tk_e, tn_e), lambda i, j, k: (k, j)),   # U
                pl.BlockSpec((tk_e, tn_e), lambda i, j, k: (k, j)),   # W.T
            ],
            out_specs=pl.BlockSpec((tm_e, tn_e), lambda i, j, k: (i, j)),
            scratch_shapes=[
                pltpu.VMEM((tm_e, tn_e), jnp.float32),  # gate-logit accumulator
                pltpu.VMEM((tm_e, tn_e), jnp.float32),  # linear-product accumulator
            ],
        )
        kernel = _gated_relu_kernel_multi_k
        dims = ("parallel", "parallel", "arbitrary")

    out = pl.pallas_call(
        kernel,
        out_shape=jax.ShapeDtypeStruct((Mp, Np), out_dtype),
        grid_spec=grid_spec,
        compiler_params=pltpu.CompilerParams(
            dimension_semantics=dims,
            vmem_limit_bytes=32 * 1024 * 1024,
        ),
        cost_estimate=cost,
    )(xb, U_b, Wt_b)

    if (Mp, Np) != (M, n_out):
        out = out[:M, :n_out]
    return out


def make_gated_relu_layer(U, W, *, tm=256, tn=512, tk=2048):
    """Build a jitted forward pass for the fixed-weight GatedReLULayer.

    One-time (outside-jit) weight prep: W transposed to (K, N), both weights
    cast to bf16 and zero-padded to tile-aligned (Kp, Np).

    Default tiles (tm=256, tn=512, tk up to 2048, i.e. a single K step for
    K <= 2048) fit the 32 MiB scoped-VMEM budget on v5e/v6e/v7x with double
    buffering. On v6e with very large M, N, K, tm=512/tn=1024/tk=1024 gives
    more reuse if desired.

    :param U: (in_features, out_features) fixed gate vectors.
    :param W: (out_features, in_features) linear weight (torch layout, no bias).
    :returns: forward(x) -> (batch, out_features) in x.dtype.
    """
    K, N = U.shape
    Nw, Kw = W.shape
    assert (K, N) == (Kw, Nw), "U must be (in, out); W must be (out, in)."

    tn_e = _balanced_tile(N, tn, 128)
    tk_e = _balanced_tile(K, tk, 128)
    Np = _cdiv(N, tn_e) * tn_e
    Kp = _cdiv(K, tk_e) * tk_e

    U_b = jnp.asarray(U).astype(jnp.bfloat16)
    Wt_b = jnp.asarray(W).T.astype(jnp.bfloat16)
    if (Kp, Np) != (K, N):
        U_b = jnp.pad(U_b, ((0, Kp - K), (0, Np - N)))
        Wt_b = jnp.pad(Wt_b, ((0, Kp - K), (0, Np - N)))
    U_b = jax.device_put(U_b)
    Wt_b = jax.device_put(Wt_b)

    def forward(x):
        return _gated_relu_forward(x, U_b, Wt_b, n_out=N, tm=tm, tn=tn_e, tk=tk_e)

    return forward


# --------------------------------------------------------------------------
# Self-test
# --------------------------------------------------------------------------
if __name__ == "__main__":
    key = jax.random.PRNGKey(0)
    kx, ku, kw = jax.random.split(key, 3)

    def _reference(x, U, W):
        # Same operand precision as the kernel (bf16 operand values, f32 math),
        # so the only discrepancy is MXU accumulation order.
        xf = x.astype(jnp.bfloat16).astype(jnp.float32)
        Uf = U.astype(jnp.bfloat16).astype(jnp.float32)
        Wtf = W.T.astype(jnp.bfloat16).astype(jnp.float32)
        logits = jnp.dot(xf, Uf, precision=jax.lax.Precision.HIGHEST)
        lin = jnp.dot(xf, Wtf, precision=jax.lax.Precision.HIGHEST)
        return logits, jnp.where(logits > 0.0, lin, 0.0)

    def _check(out, logits, ref):
        # Gate logits within rounding distance of zero may legitimately flip
        # under a different accumulation order; exclude them.
        safe = jnp.abs(logits) > 1e-3
        err = jnp.where(safe, jnp.abs(out - ref), 0.0)
        assert float(jnp.mean(safe)) > 0.99
        assert float(jnp.max(err)) < 5e-3, float(jnp.max(err))

    # ---- Problem 1: small, non-tile-aligned; exercises the single-K path. ----
    batch, in_features, out_features = 200, 96, 300
    x = jax.random.normal(kx, (batch, in_features), dtype=jnp.float32)
    U = jax.random.normal(ku, (in_features, out_features), dtype=jnp.float32)
    bound = 1.0 / float(in_features) ** 0.5
    W = jax.random.uniform(
        kw, (out_features, in_features), dtype=jnp.float32, minval=-bound, maxval=bound
    )

    layer = make_gated_relu_layer(U, W)
    out = jax.block_until_ready(layer(x))
    assert out.shape == (batch, out_features)
    assert out.dtype == x.dtype
    logits, ref = _reference(x, U, W)
    _check(out, logits, ref)

    # ---- Problem 2: K > tk; exercises the multi-K accumulator path. ----
    M2, K2, N2 = 64, 384, 256
    x2 = jax.random.normal(kx, (M2, K2), dtype=jnp.float32)
    U2 = jax.random.normal(ku, (K2, N2), dtype=jnp.float32)
    bound2 = 1.0 / float(K2) ** 0.5
    W2 = jax.random.uniform(
        kw, (N2, K2), dtype=jnp.float32, minval=-bound2, maxval=bound2
    )
    layer2 = make_gated_relu_layer(U2, W2, tm=64, tn=128, tk=128)
    out2 = jax.block_until_ready(layer2(x2))
    assert out2.shape == (M2, N2)
    logits2, ref2 = _reference(x2, U2, W2)
    _check(out2, logits2, ref2)

    print("KERNEL_OK")
</pallas_src>

<mosaic_0001>
module attributes {stable_mosaic.version = 11 : i64} {
  func.func @_gated_relu_kernel_single_k(%arg0: i32, %arg1: i32, %arg2: memref<208x128xbf16, #tpu.memory_space<vmem>>, %arg3: memref<128x128xbf16, #tpu.memory_space<vmem>>, %arg4: memref<128x128xbf16, #tpu.memory_space<vmem>>, %arg5: memref<208x128xf32, #tpu.memory_space<vmem>>) attributes {dimension_semantics = [#tpu.dimension_semantics<parallel>, #tpu.dimension_semantics<parallel>], iteration_bounds = array<i64: 1, 3>, scalar_prefetch = 0 : i64, scratch_operands = 0 : i64, tpu.core_type = #tpu.core_type<tc>, window_params = [{transform_indices = @transform_0, window_bounds = array<i64: 208, 128>}, {transform_indices = @transform_1, window_bounds = array<i64: 128, 128>}, {transform_indices = @transform_2, window_bounds = array<i64: 128, 128>}, {transform_indices = @transform_3, window_bounds = array<i64: 208, 128>}]} {
    %c0 = arith.constant 0 : index
    %c0_0 = arith.constant 0 : index
    %0 = vector.load %arg2[%c0, %c0_0] : memref<208x128xbf16, #tpu.memory_space<vmem>>, vector<208x128xbf16>
    %c0_1 = arith.constant 0 : index
    %c0_2 = arith.constant 0 : index
    %1 = vector.load %arg3[%c0_1, %c0_2] : memref<128x128xbf16, #tpu.memory_space<vmem>>, vector<128x128xbf16>
    %cst = arith.constant dense<0.000000e+00> : vector<208x128xf32>
    %2 = tpu.matmul %0, %1, %cst {dimension_numbers = #tpu.dot_dimension_numbers<[1], [0], [0], [1], [0, 0, 1, 1], [], []>} : vector<208x128xbf16>, vector<128x128xbf16>, vector<208x128xf32> -> vector<208x128xf32>
    %c0_3 = arith.constant 0 : index
    %c0_4 = arith.constant 0 : index
    %3 = vector.load %arg4[%c0_3, %c0_4] : memref<128x128xbf16, #tpu.memory_space<vmem>>, vector<128x128xbf16>
    %cst_5 = arith.constant dense<0.000000e+00> : vector<208x128xf32>
    %4 = tpu.matmul %0, %3, %cst_5 {dimension_numbers = #tpu.dot_dimension_numbers<[1], [0], [0], [1], [0, 0, 1, 1], [], []>} : vector<208x128xbf16>, vector<128x128xbf16>, vector<208x128xf32> -> vector<208x128xf32>
    %cst_6 = arith.constant 0.000000e+00 : f32
    %5 = vector.broadcast %cst_6 : f32 to vector<208x128xf32>
    %6 = arith.cmpf ogt, %2, %5 : vector<208x128xf32>
    %cst_7 = arith.constant 0.000000e+00 : f32
    %7 = vector.broadcast %cst_7 : f32 to vector<208x128xf32>
    %8 = arith.select %6, %4, %7 : vector<208x128xi1>, vector<208x128xf32>
    %c0_8 = arith.constant 0 : index
    %c0_9 = arith.constant 0 : index
    %9 = vector.load %arg5[%c0_8, %c0_9] : memref<208x128xf32, #tpu.memory_space<vmem>>, vector<208x128xf32>
    tpu.vector_store %arg5[%c0_8, %c0_9], %8 {strides = array<i32>} : memref<208x128xf32, #tpu.memory_space<vmem>>, vector<208x128xf32>,
    return
  }
  func.func @transform_0(%arg0: i32, %arg1: i32) -> (i32, i32) {
    %c0_i32 = arith.constant 0 : i32
    %c0_i32_0 = arith.constant 0 : i32
    return %arg0, %c0_i32 : i32, i32
  }
  func.func @transform_1(%arg0: i32, %arg1: i32) -> (i32, i32) {
    %c0_i32 = arith.constant 0 : i32
    %c0_i32_0 = arith.constant 0 : i32
    return %c0_i32, %arg1 : i32, i32
  }
  func.func @transform_2(%arg0: i32, %arg1: i32) -> (i32, i32) {
    %c0_i32 = arith.constant 0 : i32
    %c0_i32_0 = arith.constant 0 : i32
    return %c0_i32, %arg1 : i32, i32
  }
  func.func @transform_3(%arg0: i32, %arg1: i32) -> (i32, i32) {
    %c0_i32 = arith.constant 0 : i32
    return %arg0, %arg1 : i32, i32
  }
}

</mosaic_0001>

<bundles_post_ra>
// kernel: _gated_relu_forward.1
= control target key start
LH: loop header
LB: loop body
LE: loop exit
PB: predicated region body
PF: predicated region fallthrough
CT: control target
= control target key end

     0   :  { %s1614_s12 = smov 0   ;;  %s1616_s13 = smov 0   ;;  %s1948_s0 = inlined_call_operand.vmem [shape: bf16[208,128], index: 0, kind: input, shape index: {}]   ;;  %s1949_s1 = inlined_call_operand.vmem [shape: bf16[128,384], index: 1, kind: input, shape index: {}]   ;;  %s1950_s2 = inlined_call_operand.vmem [shape: bf16[128,384], index: 2, kind: input, shape index: {}]   ;;  %s1951_s3 = inlined_call_operand.vmem [shape: f32[208,384], index: 3, kind: output, shape index: {}]  }
   0x1   :  { %s1618_s14 = smov 0   ;;  %s1620_s15 = smov 0  }
   0x2   :  { %s1622_s16 = smov 0  }
   0x3 LB: > { %s22_s17 = sadd.s32 1, %s1586_s15  ;;  %s1258_s18 = sadd.s32 4294967295, %s1590_s16   ;;  %s1590_s16 = sphi %s1622_s16, %s13_s16   ;;  %s1586_s15 = sphi %s1620_s15, %s1957_s15   ;;  %s1582_s14 = sphi %s1618_s14, %s1956_s14   ;;  %s1578_s13 = sphi %s1616_s13, %s1955_s13   ;;  %s1574_s12 = sphi %s1614_s12, %s1954_s12  }
   0x4   : > { %p23_p0 = scmp.ge.s32.totalorder %s22_s17, 3  ;;  %p65_p1 = scmp.ne.s32.totalorder %s1578_s13, %s1574_s12 }
   0x5   : > { %p66_p2 = scmp.eq.s32.totalorder %s1590_s16, 0  ;;  %p123_p4 = scmp.eq.s32.totalorder %s1258_s18, 2 }
   0x6   : > { %s1959_s17 = smov (%p23_p0, %s22_s17), 0  ;;  %s58_s21 = sadd.s32 1, %s1578_s13 }
   0x7   : > { %p1646_p3 = por %p66_p2, %p65_p1  ;;  %s55_s20 = ssub.s32 %s1586_s15, %s1959_s17 }
   0x8   : > { %p56_p5 = scmp.eq.s32.totalorder %s55_s20, 0  ;;  %p1653_p6 = por %p123_p4, %p65_p1 }
   0x9   : > { %p1262_p7 = scmp.ge.s32.totalorder %s1590_s16, 3 }
   0xa   : > { %s1658_s23 = scalar_select %p56_p5, %s1578_s13, %s58_s21  }
   0xb   : > { %154 = sbr.rel (%p1262_p7) target bundleno = 44 (0x2c), region = 20 }
  0x10   : > { %157 = sbr.rel (!%p1646_p3) target bundleno = 30 (0x1e), region = 24  ;;  %s159_s24 = sand.u32 (%p1646_p3), 1, %s1578_s13  }
  0x11   : > { %s1264_s25 = sshll.u32 (%p1646_p3), %s1586_s15, 2  ;;  %s1263_s26 = sshll.u32 (%p1646_p3), %s159_s24, 6 }
  0x12   : > { %s1668_s29 = scalar_lea.vmem (%p1646_p3), %s1949_s1, %s1264_s25  ;;  %s161_s30 = scalar_lea.vmem (%p1646_p3), [#allocation2], %s1263_s26 }
  0x13   : > { %v180_v0 = vld [vmem:[%s1668_s29] sm:$0xf] (%p1646_p3)  ;;  %v182_v1 = vld [vmem:[%s1668_s29 + $0xc] sm:$0xf] (%p1646_p3)  ;;  %v184_v2 = vld [vmem:[%s1668_s29 + $0x18] sm:$0xf] (%p1646_p3) }
  0x14   : > { %181 = vst [vmem:[%s161_s30] sm:$0xf] (%p1646_p3), %v180_v0  ;;  %183 = vst [vmem:[%s161_s30 + $0x4] sm:$0xf] (%p1646_p3), %v182_v1  ;;  %v186_v3 = vld [vmem:[%s1668_s29 + $0x24] sm:$0xf] (%p1646_p3) }
  0x15   : > { %v188_v4 = vld [vmem:[%s1668_s29 + $0x30] sm:$0xf]  ;;  %185 = vst [vmem:[%s161_s30 + $0x8] sm:$0xf] %v184_v2  ;;  %187 = vst [vmem:[%s161_s30 + $0xc] sm:$0xf] %v186_v3 }
  0x16   : > { %189 = vst [vmem:[%s161_s30 + $0x10] sm:$0xf] %v188_v4  ;;  %v190_v5 = vld [vmem:[%s1668_s29 + $0x3c] sm:$0xf]  ;;  %v192_v6 = vld [vmem:[%s1668_s29 + $0x48] sm:$0xf] }
  0x17   : > { %v194_v7 = vld [vmem:[%s1668_s29 + $0x54] sm:$0xf]  ;;  %191 = vst [vmem:[%s161_s30 + $0x14] sm:$0xf] %v190_v5  ;;  %193 = vst [vmem:[%s161_s30 + $0x18] sm:$0xf] %v192_v6 }
  0x18   : > { %195 = vst [vmem:[%s161_s30 + $0x1c] sm:$0xf] %v194_v7  ;;  %v196_v8 = vld [vmem:[%s1668_s29 + $0x60] sm:$0xf]  ;;  %v198_v9 = vld [vmem:[%s1668_s29 + $0x6c] sm:$0xf] }
  0x19   : > { %v200_v10 = vld [vmem:[%s1668_s29 + $0x78] sm:$0xf]  ;;  %197 = vst [vmem:[%s161_s30 + $0x20] sm:$0xf] %v196_v8  ;;  %199 = vst [vmem:[%s161_s30 + $0x24] sm:$0xf] %v198_v9 }
  0x1a   : > { %201 = vst [vmem:[%s161_s30 + $0x28] sm:$0xf] %v200_v10  ;;  %v202_v11 = vld [vmem:[%s1668_s29 + $0x84] sm:$0xf]  ;;  %v204_v12 = vld [vmem:[%s1668_s29 + $0x90] sm:$0xf] }
  0x1b   : > { %v206_v13 = vld [vmem:[%s1668_s29 + $0x9c] sm:$0xf]  ;;  %203 = vst [vmem:[%s161_s30 + $0x2c] sm:$0xf] %v202_v11  ;;  %205 = vst [vmem:[%s161_s30 + $0x30] sm:$0xf] %v204_v12 }
  0x1c   : > { %207 = vst [vmem:[%s161_s30 + $0x34] sm:$0xf] %v206_v13  ;;  %v208_v14 = vld [vmem:[%s1668_s29 + $0xa8] sm:$0xf]  ;;  %v210_v15 = vld [vmem:[%s1668_s29 + $0xb4] sm:$0xf] }
  0x1d   : > { %209 = vst [vmem:[%s161_s30 + $0x38] sm:$0xf] %v208_v14  ;;  %211 = vst [vmem:[%s161_s30 + $0x3c] sm:$0xf] %v210_v15 }
  0x1e PF: > { %267 = sbr.rel (!%p1646_p3) target bundleno = 44 (0x2c), region = 65  ;;  %s269_s4 = sand.u32 (%p1646_p3), 1, %s1578_s13  }
  0x1f   : > { %s1266_s5 = sshll.u32 (%p1646_p3), %s1586_s15, 2  ;;  %s1265_s6 = sshll.u32 (%p1646_p3), %s269_s4, 6 }
  0x20   : > { %s1693_s9 = scalar_lea.vmem (%p1646_p3), %s1950_s2, %s1266_s5  ;;  %s271_s10 = scalar_lea.vmem (%p1646_p3), [#allocation3], %s1265_s6 }
  0x21   : > { %v290_v16 = vld [vmem:[%s1693_s9] sm:$0xf] (%p1646_p3)  ;;  %v292_v17 = vld [vmem:[%s1693_s9 + $0xc] sm:$0xf] (%p1646_p3)  ;;  %v294_v18 = vld [vmem:[%s1693_s9 + $0x18] sm:$0xf] (%p1646_p3) }
  0x22   : > { %291 = vst [vmem:[%s271_s10] sm:$0xf] (%p1646_p3), %v290_v16  ;;  %293 = vst [vmem:[%s271_s10 + $0x4] sm:$0xf] (%p1646_p3), %v292_v17  ;;  %v296_v19 = vld [vmem:[%s1693_s9 + $0x24] sm:$0xf] (%p1646_p3) }
  0x23   : > { %v298_v20 = vld [vmem:[%s1693_s9 + $0x30] sm:$0xf]  ;;  %295 = vst [vmem:[%s271_s10 + $0x8] sm:$0xf] %v294_v18  ;;  %297 = vst [vmem:[%s271_s10 + $0xc] sm:$0xf] %v296_v19 }
  0x24   : > { %299 = vst [vmem:[%s271_s10 + $0x10] sm:$0xf] %v298_v20  ;;  %v300_v21 = vld [vmem:[%s1693_s9 + $0x3c] sm:$0xf]  ;;  %v302_v22 = vld [vmem:[%s1693_s9 + $0x48] sm:$0xf] }
  0x25   : > { %v304_v23 = vld [vmem:[%s1693_s9 + $0x54] sm:$0xf]  ;;  %301 = vst [vmem:[%s271_s10 + $0x14] sm:$0xf] %v300_v21  ;;  %303 = vst [vmem:[%s271_s10 + $0x18] sm:$0xf] %v302_v22 }
  0x26   : > { %305 = vst [vmem:[%s271_s10 + $0x1c] sm:$0xf] %v304_v23  ;;  %v306_v24 = vld [vmem:[%s1693_s9 + $0x60] sm:$0xf]  ;;  %v308_v25 = vld [vmem:[%s1693_s9 + $0x6c] sm:$0xf] }
  0x27   : > { %v310_v26 = vld [vmem:[%s1693_s9 + $0x78] sm:$0xf]  ;;  %307 = vst [vmem:[%s271_s10 + $0x20] sm:$0xf] %v306_v24  ;;  %309 = vst [vmem:[%s271_s10 + $0x24] sm:$0xf] %v308_v25 }
  0x28   : > { %311 = vst [vmem:[%s271_s10 + $0x28] sm:$0xf] %v310_v26  ;;  %v312_v27 = vld [vmem:[%s1693_s9 + $0x84] sm:$0xf]  ;;  %v314_v28 = vld [vmem:[%s1693_s9 + $0x90] sm:$0xf] }
  0x29   : > { %v316_v29 = vld [vmem:[%s1693_s9 + $0x9c] sm:$0xf]  ;;  %313 = vst [vmem:[%s271_s10 + $0x2c] sm:$0xf] %v312_v27  ;;  %315 = vst [vmem:[%s271_s10 + $0x30] sm:$0xf] %v314_v28 }
  0x2a   : > { %317 = vst [vmem:[%s271_s10 + $0x34] sm:$0xf] %v316_v29  ;;  %v318_v30 = vld [vmem:[%s1693_s9 + $0xa8] sm:$0xf]  ;;  %v320_v31 = vld [vmem:[%s1693_s9 + $0xb4] sm:$0xf] }
  0x2b   : > { %319 = vst [vmem:[%s271_s10 + $0x38] sm:$0xf] %v318_v30  ;;  %321 = vst [vmem:[%s271_s10 + $0x3c] sm:$0xf] %v320_v31 }
  0x2c PF: > { %p1267_p8 = scmp.ge.s32.totalorder %s1590_s16, 1  ;;  %p376_p9 = scmp.lt.s32.totalorder %s1590_s16, 4 }
  0x2e   : > { %p377_p10 = pnand %p1267_p8, %p376_p9 }
  0x2f   : > { %s383_s11 = sand.u32 (!%p377_p10), 1, %s1574_s12  }
  0x30   : > { %380 = sbr.rel (%p377_p10) target bundleno = 391 (0x187), region = 106  ;;  %s1268_s18 = sshll.u32 (!%p377_p10), %s383_s11, 6 }
  0x31   : > { %s1722_s19 = scalar_lea.vmem (!%p377_p10), [#allocation2], %s1268_s18  ;;  %s1725_s20 = scalar_lea.vmem (!%p377_p10), [#allocation3], %s1268_s18 }
  0x32   : > { %s1480_s4 = smul.u32 (!%p377_p10), 208, %s383_s11 }
  0x34   : > { %s1845_s5 = scalar_lea.vmem (!%p377_p10), [#allocation4], %s1480_s4 }
  0x35   : > { %v1592_v32 = vmov 0.0   ;;  %vm1593_vm0 = vmmov 0   ;;  %v1523_v33 = vld [vmem:[%s1722_s19 + $0x38] sm:$0xff]   ;;  %v1525_v35 = vld [vmem:[%s1722_s19 + $0x30] sm:$0xff]   ;;  %v1527_v37 = vld [vmem:[%s1722_s19 + $0x28] sm:$0xff]   ;;  %s1299_s12 = sshll.u32 (%p1653_p6), %s1582_s14, 3 }
  0x36   : > { %1344 = vmatprep.subr.bf16.mxu0 %v1592_v32  ;;  %1412 = vmatprep.subr.bf16.mxu1 %v1592_v32  ;;  %v1524_v34 = vld [vmem:[%s1725_s20 + $0x38] sm:$0xff]   ;;  %v1526_v36 = vld [vmem:[%s1725_s20 + $0x30] sm:$0xff]   ;;  %v1528_v38 = vld [vmem:[%s1725_s20 + $0x28] sm:$0xff]   ;;  %s1882_s7 = scalar_lea.vmem (%p1653_p6), %s1951_s3, %s1299_s12 }
  0x37   : > { %1360 = vmatprep.mubr.msk.bf16.mxu0 %vm1593_vm0, %v1592_v32  ;;  %1428 = vmatprep.mubr.msk.bf16.mxu1 %vm1593_vm0, %v1592_v32  ;;  %v1529_v39 = vld [vmem:[%s1722_s19 + $0x20] sm:$0xff]   ;;  %v1531_v41 = vld [vmem:[%s1722_s19 + $0x18] sm:$0xff]   ;;  %v1533_v43 = vld [vmem:[%s1722_s19 + $0x10] sm:$0xff]  }
  0x38   : > { %1345 = vmatpush3.bf16.msra.mxu0 %v1523_v33  ;;  %1413 = vmatpush3.bf16.msra.mxu1 %v1524_v34  ;;  %v1530_v40 = vld [vmem:[%s1725_s20 + $0x20] sm:$0xff]   ;;  %v1532_v42 = vld [vmem:[%s1725_s20 + $0x18] sm:$0xff]   ;;  %v1534_v44 = vld [vmem:[%s1725_s20 + $0x10] sm:$0xff]  }
  0x39   : > { %1346 = vmatprep.subr.bf16.mxu0 %v1592_v32  ;;  %1414 = vmatprep.subr.bf16.mxu1 %v1592_v32  ;;  %v1535_v45 = vld [vmem:[%s1722_s19 + $0x8] sm:$0xff]   ;;  %v1537_v47 = vld [vmem:[%s1722_s19] sm:$0xff]   ;;  %v1541_v51 = vld [vmem:[%s1948_s0 + $0x10] sm:$0xff]  }
  0x3a   : > { %v1536_v46 = vld [vmem:[%s1725_s20 + $0x8] sm:$0xff]   ;;  %v1538_v48 = vld [vmem:[%s1725_s20] sm:$0xff]   ;;  %v1542_v52 = vld [vmem:[%s1948_s0 + $0x18] sm:$0xff]  }
  0x3b   : > { %v1539_v49 = vld [vmem:[%s1948_s0] sm:$0xff]   ;;  %v1540_v50 = vld [vmem:[%s1948_s0 + $0x8] sm:$0xff]   ;;  %v1545_v55 = vld [vmem:[%s1948_s0 + $0x30] sm:$0xff]  }
  0x3c   : > { %1347 = vmatpush3.bf16.msra.mxu0 %v1525_v35  ;;  %1415 = vmatpush3.bf16.msra.mxu1 %v1526_v36  ;;  %v1543_v53 = vld [vmem:[%s1948_s0 + $0x20] sm:$0xff]   ;;  %v1544_v54 = vld [vmem:[%s1948_s0 + $0x28] sm:$0xff]   ;;  %v1546_v56 = vld [vmem:[%s1948_s0 + $0x38] sm:$0xff]  }
  0x3d   : > { %1348 = vmatprep.subr.bf16.mxu0 %v1592_v32  ;;  %1416 = vmatprep.subr.bf16.mxu1 %v1592_v32  ;;  %v1547_v57 = vld [vmem:[%s1948_s0 + $0x40] sm:$0xff]   ;;  %v1548_v58 = vld [vmem:[%s1948_s0 + $0x48] sm:$0xff]   ;;  %v1549_v59 = vld [vmem:[%s1948_s0 + $0x50] sm:$0xff]  }
  0x3e   : > { %v1550_v60 = vld [vmem:[%s1948_s0 + $0x58] sm:$0xff]   ;;  %v1551_v61 = vld [vmem:[%s1948_s0 + $0x60] sm:$0xff]  }
  0x40   : > { %1349 = vmatpush3.bf16.msra.mxu0 %v1527_v37  ;;  %1417 = vmatpush3.bf16.msra.mxu1 %v1528_v38 }
  0x41   : > { %1350 = vmatprep.subr.bf16.mxu0 %v1592_v32  ;;  %1418 = vmatprep.subr.bf16.mxu1 %v1592_v32 }
  0x44   : > { %1351 = vmatpush3.bf16.msra.mxu0 %v1529_v39  ;;  %1419 = vmatpush3.bf16.msra.mxu1 %v1530_v40 }
  0x45   : > { %1352 = vmatprep.subr.bf16.mxu0 %v1592_v32  ;;  %1420 = vmatprep.subr.bf16.mxu1 %v1592_v32 }
  0x48   : > { %1353 = vmatpush3.bf16.msra.mxu0 %v1531_v41  ;;  %1421 = vmatpush3.bf16.msra.mxu1 %v1532_v42 }
  0x49   : > { %1354 = vmatprep.subr.bf16.mxu0 %v1592_v32  ;;  %1422 = vmatprep.subr.bf16.mxu1 %v1592_v32 }
  0x4c   : > { %1355 = vmatpush3.bf16.msra.mxu0 %v1533_v43  ;;  %1423 = vmatpush3.bf16.msra.mxu1 %v1534_v44 }
  0x4d   : > { %1356 = vmatprep.subr.bf16.mxu0 %v1592_v32  ;;  %1424 = vmatprep.subr.bf16.mxu1 %v1592_v32 }
  0x50   : > { %1357 = vmatpush3.bf16.msra.mxu0 %v1535_v45  ;;  %1425 = vmatpush3.bf16.msra.mxu1 %v1536_v46 }
  0x51   : > { %1358 = vmatprep.subr.bf16.mxu0 %v1592_v32  ;;  %1426 = vmatprep.subr.bf16.mxu1 %v1592_v32 }
  0x54   : > { %1359 = vmatpush3.bf16.msra.mxu0 %v1537_v47  ;;  %1427 = vmatpush3.bf16.msra.mxu1 %v1538_v48 }
  0x57   : > { %1361 = vmatmul.mubr.bf16.vlgmr.msra.gmra.mxu0 %v1539_v49  ;;  %1429 = vmatmul.mubr.bf16.vlgmr.msra.gmra.mxu1 %v1539_v49 }
  0x58   : > { %1364 = vmatprep.mubr.msk.bf16.mxu0 %vm1593_vm0, %v1592_v32  ;;  %1432 = vmatprep.mubr.msk.bf16.mxu1 %vm1593_vm0, %v1592_v32 }
  0x5f   : > { %1365 = vmatmul.mubr.bf16.gmra.mxu0 %v1540_v50  ;;  %1433 = vmatmul.mubr.bf16.gmra.mxu1 %v1540_v50 }
  0x60   : > { %1368 = vmatprep.mubr.msk.bf16.mxu0 %vm1593_vm0, %v1592_v32  ;;  %1436 = vmatprep.mubr.msk.bf16.mxu1 %vm1593_vm0, %v1592_v32 }
  0x67   : > { %1369 = vmatmul.mubr.bf16.gmra.mxu0 %v1541_v51  ;;  %1437 = vmatmul.mubr.bf16.gmra.mxu1 %v1541_v51 }
  0x68   : > { %1372 = vmatprep.mubr.msk.bf16.mxu0 %vm1593_vm0, %v1592_v32  ;;  %1440 = vmatprep.mubr.msk.bf16.mxu1 %vm1593_vm0, %v1592_v32 }
  0x6f   : > { %1373 = vmatmul.mubr.bf16.gmra.mxu0 %v1542_v52  ;;  %1441 = vmatmul.mubr.bf16.gmra.mxu1 %v1542_v52 }
  0x70   : > { %1376 = vmatprep.mubr.msk.bf16.mxu0 %vm1593_vm0, %v1592_v32  ;;  %1444 = vmatprep.mubr.msk.bf16.mxu1 %vm1593_vm0, %v1592_v32 }
  0x77   : > { %1377 = vmatmul.mubr.bf16.gmra.mxu0 %v1543_v53  ;;  %1445 = vmatmul.mubr.bf16.gmra.mxu1 %v1543_v53 }
  0x78   : > { %1380 = vmatprep.mubr.msk.bf16.mxu0 %vm1593_vm0, %v1592_v32  ;;  %1448 = vmatprep.mubr.msk.bf16.mxu1 %vm1593_vm0, %v1592_v32 }
  0x7f   : > { %1381 = vmatmul.mubr.bf16.gmra.mxu0 %v1544_v54  ;;  %1449 = vmatmul.mubr.bf16.gmra.mxu1 %v1544_v54 }
  0x80   : > { %1384 = vmatprep.mubr.msk.bf16.mxu0 %vm1593_vm0, %v1592_v32  ;;  %1452 = vmatprep.mubr.msk.bf16.mxu1 %vm1593_vm0, %v1592_v32 }
  0x87   : > { %1385 = vmatmul.mubr.bf16.gmra.mxu0 %v1545_v55  ;;  %1453 = vmatmul.mubr.bf16.gmra.mxu1 %v1545_v55 }
  0x88   : > { %1388 = vmatprep.mubr.msk.bf16.mxu0 %vm1593_vm0, %v1592_v32  ;;  %1456 = vmatprep.mubr.msk.bf16.mxu1 %vm1593_vm0, %v1592_v32 }
  0x8f   : > { %1389 = vmatmul.mubr.bf16.gmra.mxu0 %v1546_v56  ;;  %1457 = vmatmul.mubr.bf16.gmra.mxu1 %v1546_v56 }
  0x90   : > { %1392 = vmatprep.mubr.msk.bf16.mxu0 %vm1593_vm0, %v1592_v32  ;;  %1460 = vmatprep.mubr.msk.bf16.mxu1 %vm1593_vm0, %v1592_v32 }
  0x97   : > { %1393 = vmatmul.mubr.bf16.gmra.mxu0 %v1547_v57  ;;  %1461 = vmatmul.mubr.bf16.gmra.mxu1 %v1547_v57 }
  0x98   : > { %1396 = vmatprep.mubr.msk.bf16.mxu0 %vm1593_vm0, %v1592_v32  ;;  %1464 = vmatprep.mubr.msk.bf16.mxu1 %vm1593_vm0, %v1592_v32 }
  0x9f   : > { %1397 = vmatmul.mubr.bf16.gmra.mxu0 %v1548_v58  ;;  %1465 = vmatmul.mubr.bf16.gmra.mxu1 %v1548_v58 }
  0xa0   : > { %1400 = vmatprep.mubr.msk.bf16.mxu0 %vm1593_vm0, %v1592_v32  ;;  %1468 = vmatprep.mubr.msk.bf16.mxu1 %vm1593_vm0, %v1592_v32 }
  0xa7   : > { %1401 = vmatmul.mubr.bf16.gmra.mxu0 %v1549_v59  ;;  %1469 = vmatmul.mubr.bf16.gmra.mxu1 %v1549_v59 }
  0xa8   : > { %1404 = vmatprep.mubr.msk.bf16.mxu0 %vm1593_vm0, %v1592_v32  ;;  %1472 = vmatprep.mubr.msk.bf16.mxu1 %vm1593_vm0, %v1592_v32 }
  0xaf   : > { %1405 = vmatmul.mubr.bf16.gmra.mxu0 %v1550_v60  ;;  %1473 = vmatmul.mubr.bf16.gmra.mxu1 %v1550_v60 }
  0xb0   : > { %1408 = vmatprep.mubr.msk.bf16.mxu0 %vm1593_vm0, %v1592_v32  ;;  %1476 = vmatprep.mubr.msk.bf16.mxu1 %vm1593_vm0, %v1592_v32 }
  0xb7   : > { %1409 = vmatmul.mubr.bf16.gmra.mxu0 %v1551_v61  ;;  %1477 = vmatmul.mubr.bf16.gmra.mxu1 %v1551_v61 }
 0x117   : > { %v631_v62 = vpop.f32.mrf.mxu0  ;;  %v832_v63 = vpop.f32.mrf.mxu1 }
 0x118   : > { %vm935_vm1 = vcmp.gt.f32.partialorder %v631_v62, 0.0 }
 0x119   : > { %v961_v0 = vsel %vm935_vm1, %v832_v63, 0.0  ;;  %v1362_v1 = vpop.f32.mrf.mxu0  ;;  %v1430_v2 = vpop.f32.mrf.mxu1 }
 0x11a   : > { %987 = vst [vmem:[%s1845_s5] sm:$0xff] %v961_v0 }
 0x11b   : > { %v634_v3 = vpop.f32.mrf.mxu0  ;;  %v835_v4 = vpop.f32.mrf.mxu1 }
 0x11c   : > { %vm936_vm2 = vcmp.gt.f32.partialorder %v634_v3, 0.0 }
 0x11d   : > { %v962_v5 = vsel %vm936_vm2, %v835_v4, 0.0  ;;  %v1363_v6 = vpop.f32.mrf.mxu0  ;;  %v1431_v7 = vpop.f32.mrf.mxu1 }
 0x11e   : > { %988 = vst [vmem:[%s1845_s5 + $0x8] sm:$0xff] %v962_v5 }
 0x11f   : > { %v639_v8 = vpop.f32.mrf.mxu0  ;;  %v840_v9 = vpop.f32.mrf.mxu1 }
 0x120   : > { %vm937_vm3 = vcmp.gt.f32.partialorder %v639_v8, 0.0 }
 0x121   : > { %v963_v10 = vsel %vm937_vm3, %v840_v9, 0.0  ;;  %v1366_v11 = vpop.f32.mrf.mxu0  ;;  %v1434_v12 = vpop.f32.mrf.mxu1 }
 0x122   : > { %989 = vst [vmem:[%s1845_s5 + $0x10] sm:$0xff] %v963_v10 }
 0x123   : > { %v642_v13 = vpop.f32.mrf.mxu0  ;;  %v843_v14 = vpop.f32.mrf.mxu1 }
 0x124   : > { %vm938_vm4 = vcmp.gt.f32.partialorder %v642_v13, 0.0 }
 0x125   : > { %v964_v15 = vsel %vm938_vm4, %v843_v14, 0.0  ;;  %v1367_v16 = vpop.f32.mrf.mxu0  ;;  %v1435_v17 = vpop.f32.mrf.mxu1 }
 0x126   : > { %990 = vst [vmem:[%s1845_s5 + $0x18] sm:$0xff] %v964_v15 }
 0x127   : > { %v647_v18 = vpop.f32.mrf.mxu0  ;;  %v848_v19 = vpop.f32.mrf.mxu1 }
 0x128   : > { %vm939_vm5 = vcmp.gt.f32.partialorder %v647_v18, 0.0 }
 0x129   : > { %v965_v20 = vsel %vm939_vm5, %v848_v19, 0.0  ;;  %v1370_v21 = vpop.f32.mrf.mxu0  ;;  %v1438_v22 = vpop.f32.mrf.mxu1 }
 0x12a   : > { %991 = vst [vmem:[%s1845_s5 + $0x20] sm:$0xff] %v965_v20 }
 0x12b   : > { %v650_v23 = vpop.f32.mrf.mxu0  ;;  %v851_v24 = vpop.f32.mrf.mxu1 }
 0x12c   : > { %vm940_vm6 = vcmp.gt.f32.partialorder %v650_v23, 0.0 }
 0x12d   : > { %v966_v25 = vsel %vm940_vm6, %v851_v24, 0.0  ;;  %v1371_v26 = vpop.f32.mrf.mxu0  ;;  %v1439_v27 = vpop.f32.mrf.mxu1 }
 0x12e   : > { %992 = vst [vmem:[%s1845_s5 + $0x28] sm:$0xff] %v966_v25 }
 0x12f   : > { %v655_v28 = vpop.f32.mrf.mxu0  ;;  %v856_v29 = vpop.f32.mrf.mxu1 }
 0x130   : > { %vm941_vm7 = vcmp.gt.f32.partialorder %v655_v28, 0.0 }
 0x131   : > { %v967_v30 = vsel %vm941_vm7, %v856_v29, 0.0  ;;  %v1374_v31 = vpop.f32.mrf.mxu0  ;;  %v1442_v32 = vpop.f32.mrf.mxu1 }
 0x132   : > { %993 = vst [vmem:[%s1845_s5 + $0x30] sm:$0xff] %v967_v30 }
 0x133   : > { %v658_v33 = vpop.f32.mrf.mxu0  ;;  %v859_v34 = vpop.f32.mrf.mxu1 }
 0x134   : > { %vm942_vm8 = vcmp.gt.f32.partialorder %v658_v33, 0.0 }
 0x135   : > { %v968_v35 = vsel %vm942_vm8, %v859_v34, 0.0  ;;  %v1375_v36 = vpop.f32.mrf.mxu0  ;;  %v1443_v37 = vpop.f32.mrf.mxu1 }
 0x136   : > { %994 = vst [vmem:[%s1845_s5 + $0x38] sm:$0xff] %v968_v35 }
 0x137   : > { %v663_v38 = vpop.f32.mrf.mxu0  ;;  %v864_v39 = vpop.f32.mrf.mxu1 }
 0x138   : > { %vm943_vm9 = vcmp.gt.f32.partialorder %v663_v38, 0.0 }
 0x139   : > { %v969_v40 = vsel %vm943_vm9, %v864_v39, 0.0  ;;  %v1378_v41 = vpop.f32.mrf.mxu0  ;;  %v1446_v42 = vpop.f32.mrf.mxu1 }
 0x13a   : > { %995 = vst [vmem:[%s1845_s5 + $0x40] sm:$0xff] %v969_v40 }
 0x13b   : > { %v666_v43 = vpop.f32.mrf.mxu0  ;;  %v867_v44 = vpop.f32.mrf.mxu1 }
 0x13c   : > { %vm944_vm10 = vcmp.gt.f32.partialorder %v666_v43, 0.0 }
 0x13d   : > { %v970_v45 = vsel %vm944_vm10, %v867_v44, 0.0  ;;  %v1379_v46 = vpop.f32.mrf.mxu0  ;;  %v1447_v47 = vpop.f32.mrf.mxu1 }
 0x13e   : > { %996 = vst [vmem:[%s1845_s5 + $0x48] sm:$0xff] %v970_v45 }
 0x13f   : > { %v671_v48 = vpop.f32.mrf.mxu0  ;;  %v872_v49 = vpop.f32.mrf.mxu1 }
 0x140   : > { %vm945_vm11 = vcmp.gt.f32.partialorder %v671_v48, 0.0 }
 0x141   : > { %v971_v50 = vsel %vm945_vm11, %v872_v49, 0.0  ;;  %v1382_v51 = vpop.f32.mrf.mxu0  ;;  %v1450_v52 = vpop.f32.mrf.mxu1 }
 0x142   : > { %997 = vst [vmem:[%s1845_s5 + $0x50] sm:$0xff] %v971_v50 }
 0x143   : > { %v674_v53 = vpop.f32.mrf.mxu0  ;;  %v875_v54 = vpop.f32.mrf.mxu1 }
 0x144   : > { %vm946_vm12 = vcmp.gt.f32.partialorder %v674_v53, 0.0 }
 0x145   : > { %v972_v55 = vsel %vm946_vm12, %v875_v54, 0.0  ;;  %v1383_v56 = vpop.f32.mrf.mxu0  ;;  %v1451_v57 = vpop.f32.mrf.mxu1 }
 0x146   : > { %998 = vst [vmem:[%s1845_s5 + $0x58] sm:$0xff] %v972_v55 }
 0x147   : > { %v679_v58 = vpop.f32.mrf.mxu0  ;;  %v880_v59 = vpop.f32.mrf.mxu1 }
 0x148   : > { %vm947_vm13 = vcmp.gt.f32.partialorder %v679_v58, 0.0 }
 0x149   : > { %v973_v60 = vsel %vm947_vm13, %v880_v59, 0.0  ;;  %v1386_v61 = vpop.f32.mrf.mxu0  ;;  %v1454_v62 = vpop.f32.mrf.mxu1 }
 0x14a   : > { %999 = vst [vmem:[%s1845_s5 + $0x60] sm:$0xff] %v973_v60 }
 0x14b   : > { %v682_v63 = vpop.f32.mrf.mxu0  ;;  %v883_v0 = vpop.f32.mrf.mxu1 }
 0x14c   : > { %vm948_vm14 = vcmp.gt.f32.partialorder %v682_v63, 0.0 }
 0x14d   : > { %v974_v1 = vsel %vm948_vm14, %v883_v0, 0.0  ;;  %v1387_v2 = vpop.f32.mrf.mxu0  ;;  %v1455_v3 = vpop.f32.mrf.mxu1  ;;  %v1103_v0 = vld [vmem:[%s1845_s5] sm:$0xff] (%p1653_p6) }
 0x14e   : > { %1000 = vst [vmem:[%s1845_s5 + $0x68] sm:$0xff] %v974_v1  ;;  %v1105_v1 = vld [vmem:[%s1845_s5 + $0x8] sm:$0xff] (%p1653_p6)  ;;  %v1107_v2 = vld [vmem:[%s1845_s5 + $0x10] sm:$0xff] (%p1653_p6)  ;;  %v1109_v3 = vld [vmem:[%s1845_s5 + $0x18] sm:$0xff] (%p1653_p6) }
 0x14f   : > { %v687_v4 = vpop.f32.mrf.mxu0  ;;  %v888_v5 = vpop.f32.mrf.mxu1  ;;  %1104 = vst [vmem:[%s1882_s7] sm:$0xff] (%p1653_p6), %v1103_v0  ;;  %1106 = vst [vmem:[%s1882_s7 + $0x18] sm:$0xff] (%p1653_p6), %v1105_v1 }
 0x150   : > { %vm949_vm15 = vcmp.gt.f32.partialorder %v687_v4, 0.0  ;;  %v1111_v4 = vld [vmem:[%s1845_s5 + $0x20] sm:$0xff] (%p1653_p6)  ;;  %1108 = vst [vmem:[%s1882_s7 + $0x30] sm:$0xff] (%p1653_p6), %v1107_v2  ;;  %1110 = vst [vmem:[%s1882_s7 + $0x48] sm:$0xff] (%p1653_p6), %v1109_v3 }
 0x151   : > { %v975_v6 = vsel %vm949_vm15, %v888_v5, 0.0  ;;  %v1390_v7 = vpop.f32.mrf.mxu0  ;;  %v1458_v8 = vpop.f32.mrf.mxu1  ;;  %v1113_v5 = vld [vmem:[%s1845_s5 + $0x28] sm:$0xff] (%p1653_p6)  ;;  %1112 = vst [vmem:[%s1882_s7 + $0x60] sm:$0xff] (%p1653_p6), %v1111_v4 }
 0x152   : > { %1001 = vst [vmem:[%s1845_s5 + $0x70] sm:$0xff] %v975_v6  ;;  %1114 = vst [vmem:[%s1882_s7 + $0x78] sm:$0xff] (%p1653_p6), %v1113_v5  ;;  %v1115_v6 = vld [vmem:[%s1845_s5 + $0x30] sm:$0xff] (%p1653_p6)  ;;  %v1117_v7 = vld [vmem:[%s1845_s5 + $0x38] sm:$0xff] (%p1653_p6) }
 0x153   : > { %v690_v9 = vpop.f32.mrf.mxu0  ;;  %v891_v10 = vpop.f32.mrf.mxu1  ;;  %v1119_v8 = vld [vmem:[%s1845_s5 + $0x40] sm:$0xff] (%p1653_p6)  ;;  %1116 = vst [vmem:[%s1882_s7 + $0x90] sm:$0xff] (%p1653_p6), %v1115_v6  ;;  %1118 = vst [vmem:[%s1882_s7 + $0xa8] sm:$0xff] (%p1653_p6), %v1117_v7 }
 0x154   : > { %vm950_vm0 = vcmp.gt.f32.partialorder %v690_v9, 0.0  ;;  %1120 = vst [vmem:[%s1882_s7 + $0xc0] sm:$0xff] (%p1653_p6), %v1119_v8  ;;  %v1121_v9 = vld [vmem:[%s1845_s5 + $0x48] sm:$0xff] (%p1653_p6) }
 0x155   : > { %v976_v11 = vsel %vm950_vm0, %v891_v10, 0.0  ;;  %v1391_v12 = vpop.f32.mrf.mxu0  ;;  %v1459_v13 = vpop.f32.mrf.mxu1  ;;  %v1123_v10 = vld [vmem:[%s1845_s5 + $0x50] sm:$0xff] (%p1653_p6)  ;;  %1122 = vst [vmem:[%s1882_s7 + $0xd8] sm:$0xff] (%p1653_p6), %v1121_v9 }
 0x156   : > { %1002 = vst [vmem:[%s1845_s5 + $0x78] sm:$0xff] %v976_v11  ;;  %v1125_v11 = vld [vmem:[%s1845_s5 + $0x58] sm:$0xff] (%p1653_p6)  ;;  %1124 = vst [vmem:[%s1882_s7 + $0xf0] sm:$0xff] (%p1653_p6), %v1123_v10  ;;  %v1127_v12 = vld [vmem:[%s1845_s5 + $0x60] sm:$0xff] (%p1653_p6) }
 0x157   : > { %v695_v14 = vpop.f32.mrf.mxu0  ;;  %v896_v15 = vpop.f32.mrf.mxu1  ;;  %1126 = vst [vmem:[%s1882_s7 + $0x108] sm:$0xff] (%p1653_p6), %v1125_v11  ;;  %v1129_v13 = vld [vmem:[%s1845_s5 + $0x68] sm:$0xff] (%p1653_p6)  ;;  %1128 = vst [vmem:[%s1882_s7 + $0x120] sm:$0xff] (%p1653_p6), %v1127_v12 }
 0x158   : > { %vm951_vm1 = vcmp.gt.f32.partialorder %v695_v14, 0.0  ;;  %1130 = vst [vmem:[%s1882_s7 + $0x138] sm:$0xff] (%p1653_p6), %v1129_v13 }
 0x159   : > { %v977_v16 = vsel %vm951_vm1, %v896_v15, 0.0  ;;  %v1394_v17 = vpop.f32.mrf.mxu0  ;;  %v1462_v18 = vpop.f32.mrf.mxu1  ;;  %v1131_v14 = vld [vmem:[%s1845_s5 + $0x70] sm:$0xff] (%p1653_p6) }
 0x15a   : > { %1003 = vst [vmem:[%s1845_s5 + $0x80] sm:$0xff] %v977_v16  ;;  %1132 = vst [vmem:[%s1882_s7 + $0x150] sm:$0xff] (%p1653_p6), %v1131_v14 }
 0x15b   : > { %v698_v19 = vpop.f32.mrf.mxu0  ;;  %v899_v20 = vpop.f32.mrf.mxu1 }
 0x15c   : > { %vm952_vm2 = vcmp.gt.f32.partialorder %v698_v19, 0.0 }
 0x15d   : > { %v978_v21 = vsel %vm952_vm2, %v899_v20, 0.0  ;;  %v1395_v22 = vpop.f32.mrf.mxu0  ;;  %v1463_v23 = vpop.f32.mrf.mxu1  ;;  %v1133_v15 = vld [vmem:[%s1845_s5 + $0x78] sm:$0xff] (%p1653_p6) }
 0x15e   : > { %1004 = vst [vmem:[%s1845_s5 + $0x88] sm:$0xff] %v978_v21  ;;  %1134 = vst [vmem:[%s1882_s7 + $0x168] sm:$0xff] (%p1653_p6), %v1133_v15 }
 0x15f   : > { %v703_v24 = vpop.f32.mrf.mxu0  ;;  %v904_v25 = vpop.f32.mrf.mxu1 }
 0x160   : > { %vm953_vm3 = vcmp.gt.f32.partialorder %v703_v24, 0.0 }
 0x161   : > { %v979_v26 = vsel %vm953_vm3, %v904_v25, 0.0  ;;  %v1398_v27 = vpop.f32.mrf.mxu0  ;;  %v1466_v28 = vpop.f32.mrf.mxu1  ;;  %v1135_v16 = vld [vmem:[%s1845_s5 + $0x80] sm:$0xff] (%p1653_p6) }
 0x162   : > { %1005 = vst [vmem:[%s1845_s5 + $0x90] sm:$0xff] %v979_v26  ;;  %1136 = vst [vmem:[%s1882_s7 + $0x180] sm:$0xff] (%p1653_p6), %v1135_v16 }
 0x163   : > { %v706_v29 = vpop.f32.mrf.mxu0  ;;  %v907_v30 = vpop.f32.mrf.mxu1 }
 0x164   : > { %vm954_vm4 = vcmp.gt.f32.partialorder %v706_v29, 0.0 }
 0x165   : > { %v980_v31 = vsel %vm954_vm4, %v907_v30, 0.0  ;;  %v1399_v32 = vpop.f32.mrf.mxu0  ;;  %v1467_v33 = vpop.f32.mrf.mxu1  ;;  %v1137_v17 = vld [vmem:[%s1845_s5 + $0x88] sm:$0xff] (%p1653_p6) }
 0x166   : > { %1006 = vst [vmem:[%s1845_s5 + $0x98] sm:$0xff] %v980_v31  ;;  %1138 = vst [vmem:[%s1882_s7 + $0x198] sm:$0xff] (%p1653_p6), %v1137_v17 }
 0x167   : > { %v711_v34 = vpop.f32.mrf.mxu0  ;;  %v912_v35 = vpop.f32.mrf.mxu1 }
 0x168   : > { %vm955_vm5 = vcmp.gt.f32.partialorder %v711_v34, 0.0 }
 0x169   : > { %v981_v36 = vsel %vm955_vm5, %v912_v35, 0.0  ;;  %v1402_v37 = vpop.f32.mrf.mxu0  ;;  %v1470_v38 = vpop.f32.mrf.mxu1  ;;  %v1139_v18 = vld [vmem:[%s1845_s5 + $0x90] sm:$0xff] (%p1653_p6) }
 0x16a   : > { %1007 = vst [vmem:[%s1845_s5 + $0xa0] sm:$0xff] %v981_v36  ;;  %1140 = vst [vmem:[%s1882_s7 + $0x1b0] sm:$0xff] (%p1653_p6), %v1139_v18 }
 0x16b   : > { %v714_v39 = vpop.f32.mrf.mxu0  ;;  %v915_v40 = vpop.f32.mrf.mxu1 }
 0x16c   : > { %vm956_vm6 = vcmp.gt.f32.partialorder %v714_v39, 0.0 }
 0x16d   : > { %v982_v41 = vsel %vm956_vm6, %v915_v40, 0.0  ;;  %v1403_v42 = vpop.f32.mrf.mxu0  ;;  %v1471_v43 = vpop.f32.mrf.mxu1  ;;  %v1141_v19 = vld [vmem:[%s1845_s5 + $0x98] sm:$0xff] (%p1653_p6) }
 0x16e   : > { %1008 = vst [vmem:[%s1845_s5 + $0xa8] sm:$0xff] %v982_v41  ;;  %1142 = vst [vmem:[%s1882_s7 + $0x1c8] sm:$0xff] (%p1653_p6), %v1141_v19 }
 0x16f   : > { %v719_v44 = vpop.f32.mrf.mxu0  ;;  %v920_v45 = vpop.f32.mrf.mxu1 }
 0x170   : > { %vm957_vm7 = vcmp.gt.f32.partialorder %v719_v44, 0.0 }
 0x171   : > { %v983_v46 = vsel %vm957_vm7, %v920_v45, 0.0  ;;  %v1406_v47 = vpop.f32.mrf.mxu0  ;;  %v1474_v48 = vpop.f32.mrf.mxu1  ;;  %v1143_v20 = vld [vmem:[%s1845_s5 + $0xa0] sm:$0xff] (%p1653_p6) }
 0x172   : > { %1009 = vst [vmem:[%s1845_s5 + $0xb0] sm:$0xff] %v983_v46  ;;  %1144 = vst [vmem:[%s1882_s7 + $0x1e0] sm:$0xff] (%p1653_p6), %v1143_v20 }
 0x173   : > { %v722_v49 = vpop.f32.mrf.mxu0  ;;  %v923_v50 = vpop.f32.mrf.mxu1 }
 0x174   : > { %vm958_vm8 = vcmp.gt.f32.partialorder %v722_v49, 0.0 }
 0x175   : > { %v984_v51 = vsel %vm958_vm8, %v923_v50, 0.0  ;;  %v1407_v52 = vpop.f32.mrf.mxu0  ;;  %v1475_v53 = vpop.f32.mrf.mxu1  ;;  %v1145_v21 = vld [vmem:[%s1845_s5 + $0xa8] sm:$0xff] (%p1653_p6) }
 0x176   : > { %1010 = vst [vmem:[%s1845_s5 + $0xb8] sm:$0xff] %v984_v51  ;;  %1146 = vst [vmem:[%s1882_s7 + $0x1f8] sm:$0xff] (%p1653_p6), %v1145_v21 }
 0x177   : > { %v727_v54 = vpop.f32.mrf.mxu0  ;;  %v928_v55 = vpop.f32.mrf.mxu1 }
 0x178   : > { %vm959_vm9 = vcmp.gt.f32.partialorder %v727_v54, 0.0 }
 0x179   : > { %v985_v56 = vsel %vm959_vm9, %v928_v55, 0.0  ;;  %v1410_v57 = vpop.f32.mrf.mxu0  ;;  %v1478_v58 = vpop.f32.mrf.mxu1  ;;  %v1147_v22 = vld [vmem:[%s1845_s5 + $0xb0] sm:$0xff] (%p1653_p6) }
 0x17a   : > { %1011 = vst [vmem:[%s1845_s5 + $0xc0] sm:$0xff] %v985_v56  ;;  %1019 = sbr.rel (!%p1653_p6) target bundleno = 391 (0x187), region = 118  ;;  %1148 = vst [vmem:[%s1882_s7 + $0x210] sm:$0xff] (%p1653_p6), %v1147_v22 }
 0x17b   : > { %v730_v59 = vpop.f32.mrf.mxu0  ;;  %v931_v60 = vpop.f32.mrf.mxu1 }
 0x17c   : > { %vm960_vm10 = vcmp.gt.f32.partialorder %v730_v59, 0.0 }
 0x17d   : > { %v986_v61 = vsel %vm960_vm10, %v931_v60, 0.0  ;;  %v1411_v62 = vpop.f32.mrf.mxu0  ;;  %v1479_v63 = vpop.f32.mrf.mxu1  ;;  %v1149_v23 = vld [vmem:[%s1845_s5 + $0xb8] sm:$0xff] (%p1653_p6) }
 0x17e   : > { %1012 = vst [vmem:[%s1845_s5 + $0xc8] sm:$0xff] %v986_v61  ;;  %1150 = vst [vmem:[%s1882_s7 + $0x228] sm:$0xff] (%p1653_p6), %v1149_v23 }
 0x181   : > { %v1151_v24 = vld [vmem:[%s1845_s5 + $0xc0] sm:$0xff] }
 0x182   : > { %1152 = vst [vmem:[%s1882_s7 + $0x240] sm:$0xff] %v1151_v24 }
 0x185   : > { %v1153_v25 = vld [vmem:[%s1845_s5 + $0xc8] sm:$0xff] }
 0x186   : > { %1154 = vst [vmem:[%s1882_s7 + $0x258] sm:$0xff] %v1153_v25 }
 0x187 PF: > { %s13_s16 = sadd.s32 1, %s1590_s16   ;;  %s1954_s12 = smov %s1578_s13 }
 0x188   : > { %p10_p11 = scmp.ge.s32.totalorder %s13_s16, 5   ;;  %s1955_s13 = smov %s1658_s23 }
 0x189   : > { %s1956_s14 = smov %s1586_s15  ;;  %s1957_s15 = smov %s1959_s17 }
 0x18a   :  { %12 = sbr.rel (!%p10_p11) target bundleno = 3 (0x3), region = 198 }

</bundles_post_ra>
